<compile_context>
chip_gen: v7x
topology: tpu7x:2x2x1
jax: 0.10.0
libtpu: 0.0.40
codegen_flags: <defaults>
</compile_context>

<pallas_src>
import jax
import jax.numpy as jnp
from jax.experimental import pallas as pl
from jax.experimental.pallas import tpu as pltpu

NUM_HEADS = 4


def _round_up(x, m):
    return ((x + m - 1) // m) * m


def _vmem_cap_bytes():
    """Generation-aware usable-VMEM cap (leave headroom for compiler scratch)."""
    try:
        cap = int(pltpu.get_tpu_info().vmem_capacity_bytes)
    except Exception:
        cap = 128 << 20
    # ~48 MiB on 64 MiB/TC parts (v7x), ~96-100 MiB on 128 MiB parts (v5e/v6e).
    return int(min(cap * 3 // 4, 100 << 20))


def _choose_tm(B, D, act_itemsize, out_itemsize, w_itemsize, sub, block_b=None):
    """Pick the batch-tile row count from the VMEM budget (not a fixed 512)."""
    weight_bytes = D * D * w_itemsize + D * 4            # single-buffered W_fused + f32 bias
    per_row = 2 * D * (act_itemsize + out_itemsize)      # double-buffered in + out rows
    budget_rows = max((_vmem_cap_bytes() - weight_bytes - (2 << 20)) // per_row, sub)

    tm = budget_rows if block_b is None else min(budget_rows, block_b)
    b_ceil = _round_up(B, sub)
    if B >= 512:
        # Keep >= 2 grid steps so both v7x TensorCores stay busy for big batches.
        tm = min(tm, _round_up(-(-B // 2), 256))
    tm = min(tm, b_ceil)                                  # never pad far past the batch
    if tm < b_ceil and tm >= 256:
        tm = (tm // 256) * 256                            # MXU-friendly M granularity
    tm = max(sub, (tm // sub) * sub)                      # sublane packing (16 for bf16)
    return int(tm)


# ----------------------------------------------------------------------------
# Kernel: one batch tile.  out = g @ W_fused + b_fused   (single MXU matmul)
# ----------------------------------------------------------------------------
def noise_aware_fusion_kernel(g_ref, w_ref, b_ref, out_ref):
    g = g_ref[...].astype(w_ref.dtype)                            # (TM, D)
    out = jnp.dot(g, w_ref[...],
                  preferred_element_type=jnp.float32) + b_ref[...]  # (TM, D) f32
    out_ref[...] = out.astype(out_ref.dtype)


# ----------------------------------------------------------------------------
# One-time weight preparation (hoisted out of the hot path).
# ----------------------------------------------------------------------------
def prepare_fused_params(params, matmul_dtype=jnp.float32):
    """Fold v- and out-projections into one matrix.  Exact (up to fp reassoc)
    because the length-1 softmax makes the attention weights exactly 1."""
    wv = params["wv_t"].astype(jnp.float32)
    wo = params["wo_t"].astype(jnp.float32)
    w_fused = (wv @ wo).astype(matmul_dtype)                       # (D, D)
    b_fused = (params["bv"].astype(jnp.float32) @ wo
               + params["bo"].astype(jnp.float32))                 # (1, D) f32
    return dict(w_fused=w_fused, b_fused=b_fused)


# ----------------------------------------------------------------------------
# Wrapper: batch-tiled, weight-stationary pallas_call
# ----------------------------------------------------------------------------
def noise_aware_fusion(local_feat, global_feat, fused_params, *,
                       block_b=None, out_dtype=jnp.float32):
    """Pallas TPU forward for NoiseAwareFusion.

    `local_feat` is accepted for API parity with the PyTorch module, but with a
    kv sequence length of 1 it provably cannot influence the output (softmax
    over one key == 1), so it is not streamed through the kernel.
    Assumes eval-mode forward (attention dropout == 0), matching nn.MultiheadAttention defaults.
    """
    del local_feat
    B, D = global_feat.shape
    assert D % NUM_HEADS == 0, f"dim={D} must be divisible by num_heads={NUM_HEADS}"

    w = fused_params["w_fused"]                    # (D, D), already in MXU dtype
    b = fused_params["b_fused"]                    # (1, D) f32
    w_itemsize = jnp.dtype(w.dtype).itemsize
    act_itemsize = jnp.dtype(global_feat.dtype).itemsize
    out_itemsize = jnp.dtype(out_dtype).itemsize

    sub = 16 if min(act_itemsize, w_itemsize) == 2 else 8
    tm = _choose_tm(B, D, act_itemsize, out_itemsize, w_itemsize, sub, block_b)
    b_padded = _round_up(B, tm)
    if b_padded != B:
        global_feat = jnp.pad(global_feat, ((0, b_padded - B), (0, 0)))
    grid = (b_padded // tm,)

    cost = pl.CostEstimate(
        flops=2 * b_padded * D * D,
        transcendentals=0,
        bytes_accessed=(b_padded * D * (act_itemsize + out_itemsize)
                        + D * D * w_itemsize + D * 4),
    )

    def _make_call(buffered_weights):
        if buffered_weights:
            # Constant index_map -> weights never re-fetched; single-buffer them
            # to free VMEM for larger activation tiles.
            w_spec = pl.BlockSpec((D, D), lambda i: (0, 0), pipeline_mode=pl.Buffered(1))
            b_spec = pl.BlockSpec((1, D), lambda i: (0, 0), pipeline_mode=pl.Buffered(1))
            n_w_bufs = 1
        else:
            w_spec = pl.BlockSpec((D, D), lambda i: (0, 0))
            b_spec = pl.BlockSpec((1, D), lambda i: (0, 0))
            n_w_bufs = 2
        vmem_needed = (2 * tm * D * (act_itemsize + out_itemsize)
                       + n_w_bufs * (D * D * w_itemsize + D * 4)
                       + (2 << 20))
        vmem_limit = int(min(_vmem_cap_bytes(), max(4 << 20, vmem_needed)))
        return pl.pallas_call(
            noise_aware_fusion_kernel,
            out_shape=jax.ShapeDtypeStruct((b_padded, D), out_dtype),
            grid_spec=pltpu.PrefetchScalarGridSpec(
                num_scalar_prefetch=0,
                grid=grid,
                in_specs=[
                    pl.BlockSpec((tm, D), lambda i: (i, 0)),   # global tile (streamed)
                    w_spec,                                    # W_fused (resident)
                    b_spec,                                    # b_fused (resident)
                ],
                out_specs=pl.BlockSpec((tm, D), lambda i: (i, 0)),
            ),
            compiler_params=pltpu.CompilerParams(
                dimension_semantics=("parallel",),   # shard batch tiles across TCs (v7x)
                vmem_limit_bytes=vmem_limit,
            ),
            cost_estimate=cost,
        )

    try:
        out = _make_call(True)(global_feat, w, b)
    except Exception:
        # pipeline_mode=pl.Buffered(1) unsupported on this jax build; fall back
        # to default double-buffered weights (identical numerics).
        out = _make_call(False)(global_feat, w, b)

    return out[:B] if b_padded != B else out


# ----------------------------------------------------------------------------
# Parameter init mirroring the PyTorch module (all params kept so the reference
# can run the *full* gate/q/k/softmax path).
# ----------------------------------------------------------------------------
def init_params(key, dim):
    ks = jax.random.split(key, 8)
    scale = 0.1
    wq = scale * jax.random.normal(ks[0], (dim, dim), jnp.float32)
    wk = scale * jax.random.normal(ks[1], (dim, dim), jnp.float32)
    wv = scale * jax.random.normal(ks[2], (dim, dim), jnp.float32)
    wo = scale * jax.random.normal(ks[3], (dim, dim), jnp.float32)
    b_in = scale * jax.random.normal(ks[4], (3, dim), jnp.float32)
    bo = scale * jax.random.normal(ks[5], (1, dim), jnp.float32)
    wg = scale * jax.random.normal(ks[6], (1, dim), jnp.float32)   # Linear(dim,1).weight
    bg = scale * jax.random.normal(ks[7], (1, 1), jnp.float32)     # Linear(dim,1).bias
    return dict(
        wg=wg, bg=bg,
        wq_t=wq.T, bq=b_in[0:1],
        wk_t=wk.T, bk=b_in[1:2],
        wv_t=wv.T, bv=b_in[2:3],
        wo_t=wo.T, bo=bo,
    )


# ----------------------------------------------------------------------------
# Pure-JAX reference: full faithful path (gate, q/k/v, per-head softmax) as in
# torch.nn.MultiheadAttention with seq_len == 1 (eval mode).
# ----------------------------------------------------------------------------
def ref_forward(local_feat, global_feat, params):
    gate = jax.nn.sigmoid(
        jnp.sum(local_feat * params["wg"], axis=-1, keepdims=True) + params["bg"])
    lf = local_feat * gate
    q = lf @ params["wq_t"] + params["bq"]
    k = global_feat @ params["wk_t"] + params["bk"]
    v = global_feat @ params["wv_t"] + params["bv"]
    B, D = q.shape
    hd = D // NUM_HEADS
    qh = q.reshape(B, NUM_HEADS, hd)
    kh = k.reshape(B, NUM_HEADS, hd)
    vh = v.reshape(B, NUM_HEADS, hd)
    s = (qh * kh).sum(-1, keepdims=True) / jnp.sqrt(jnp.float32(hd))
    p = jax.nn.softmax(s, axis=-1)                      # length-1 softmax -> exactly 1
    attn = (p * vh).reshape(B, D)
    return attn @ params["wo_t"] + params["bo"]


if __name__ == "__main__":
    key = jax.random.PRNGKey(0)

    # Small shape consistent with the module (dim divisible by num_heads=4).
    B, D = 2, 32
    k1, k2, k3 = jax.random.split(key, 3)
    local_feat = jax.random.normal(k1, (B, D), jnp.float32)
    global_feat = jax.random.normal(k2, (B, D), jnp.float32)
    params = init_params(k3, D)
    fused = prepare_fused_params(params)               # hoisted: once, not per call

    out = jax.block_until_ready(noise_aware_fusion(local_feat, global_feat, fused))
    ref = ref_forward(local_feat, global_feat, params)
    assert out.shape == (B, D)
    assert jnp.allclose(out, ref, atol=1e-4, rtol=1e-4), "f32 mismatch vs reference"

    # Larger case: exercises VMEM-derived tiling, batch padding, the parallel
    # batch axis, multi-step grids (block_b=128) and the bf16 fused-weight path.
    B2, D2 = 300, 128
    k4, k5, k6 = jax.random.split(jax.random.PRNGKey(1), 3)
    lf2 = jax.random.normal(k4, (B2, D2), jnp.float32)
    gf2 = jax.random.normal(k5, (B2, D2), jnp.float32)
    params2 = init_params(k6, D2)
    ref2 = ref_forward(lf2, gf2, params2)

    fused2 = prepare_fused_params(params2)
    out2 = jax.block_until_ready(noise_aware_fusion(lf2, gf2, fused2))
    assert out2.shape == (B2, D2)
    assert jnp.allclose(out2, ref2, atol=1e-3, rtol=1e-3), "tiled f32 mismatch"

    fused2_bf16 = prepare_fused_params(params2, matmul_dtype=jnp.bfloat16)
    out2_bf16 = jax.block_until_ready(
        noise_aware_fusion(lf2, gf2, fused2_bf16, block_b=128))   # grid of 3 steps
    assert jnp.allclose(out2_bf16, ref2, atol=5e-2, rtol=5e-2), "bf16 mismatch"

    print("KERNEL_OK")
</pallas_src>

<mosaic_0001>
module attributes {stable_mosaic.version = 11 : i64} {
  func.func @noise_aware_fusion_kernel(%arg0: i32, %arg1: memref<8x32xf32, #tpu.memory_space<vmem>>, %arg2: memref<32x32xf32, #tpu.memory_space<vmem>>, %arg3: memref<1x32xf32, #tpu.memory_space<vmem>>, %arg4: memref<8x32xf32, #tpu.memory_space<vmem>>) attributes {dimension_semantics = [#tpu.dimension_semantics<parallel>], iteration_bounds = array<i64: 1>, scalar_prefetch = 0 : i64, scratch_operands = 0 : i64, tpu.core_type = #tpu.core_type<tc>, window_params = [{transform_indices = @transform_0, window_bounds = array<i64: 8, 32>}, {pipeline_mode = #tpu.pipeline_mode<synchronous>, transform_indices = @transform_1, window_bounds = array<i64: 32, 32>}, {pipeline_mode = #tpu.pipeline_mode<synchronous>, transform_indices = @transform_2, window_bounds = array<i64: 1, 32>}, {transform_indices = @transform_3, window_bounds = array<i64: 8, 32>}]} {
    %c0 = arith.constant 0 : index
    %c0_0 = arith.constant 0 : index
    %0 = vector.load %arg1[%c0, %c0_0] : memref<8x32xf32, #tpu.memory_space<vmem>>, vector<8x32xf32>
    %c0_1 = arith.constant 0 : index
    %c0_2 = arith.constant 0 : index
    %1 = vector.load %arg2[%c0_1, %c0_2] : memref<32x32xf32, #tpu.memory_space<vmem>>, vector<32x32xf32>
    %cst = arith.constant dense<0.000000e+00> : vector<8x32xf32>
    %2 = tpu.matmul %0, %1, %cst {dimension_numbers = #tpu.dot_dimension_numbers<[1], [0], [0], [1], [0, 0, 1, 1], [], []>} : vector<8x32xf32>, vector<32x32xf32>, vector<8x32xf32> -> vector<8x32xf32>
    %c0_3 = arith.constant 0 : index
    %c0_4 = arith.constant 0 : index
    %3 = vector.load %arg3[%c0_3, %c0_4] : memref<1x32xf32, #tpu.memory_space<vmem>>, vector<1x32xf32>
    %4 = vector.broadcast %3 : vector<1x32xf32> to vector<8x32xf32>
    %5 = arith.addf %2, %4 : vector<8x32xf32>
    %c0_5 = arith.constant 0 : index
    %c0_6 = arith.constant 0 : index
    %6 = vector.load %arg4[%c0_5, %c0_6] : memref<8x32xf32, #tpu.memory_space<vmem>>, vector<8x32xf32>
    tpu.vector_store %arg4[%c0_5, %c0_6], %5 {strides = array<i32>} : memref<8x32xf32, #tpu.memory_space<vmem>>, vector<8x32xf32>,
    return
  }
  func.func @transform_0(%arg0: i32) -> (i32, i32) {
    %c0_i32 = arith.constant 0 : i32
    %c0_i32_0 = arith.constant 0 : i32
    return %arg0, %c0_i32 : i32, i32
  }
  func.func @transform_1(%arg0: i32) -> (i32, i32) {
    %c0_i32 = arith.constant 0 : i32
    %c0_i32_0 = arith.constant 0 : i32
    %c0_i32_1 = arith.constant 0 : i32
    return %c0_i32, %c0_i32_0 : i32, i32
  }
  func.func @transform_2(%arg0: i32) -> (i32, i32) {
    %c0_i32 = arith.constant 0 : i32
    %c0_i32_0 = arith.constant 0 : i32
    %c0_i32_1 = arith.constant 0 : i32
    return %c0_i32, %c0_i32_0 : i32, i32
  }
  func.func @transform_3(%arg0: i32) -> (i32, i32) {
    %c0_i32 = arith.constant 0 : i32
    %c0_i32_0 = arith.constant 0 : i32
    return %arg0, %c0_i32 : i32, i32
  }
}

module attributes {stable_mosaic.version = 11 : i64} {
  func.func @noise_aware_fusion_kernel(%arg0: i32, %arg1: memref<8x32xf32, #tpu.memory_space<vmem>>, %arg2: memref<32x32xf32, #tpu.memory_space<vmem>>, %arg3: memref<1x32xf32, #tpu.memory_space<vmem>>, %arg4: memref<8x32xf32, #tpu.memory_space<vmem>>) attributes {dimension_semantics = [#tpu.dimension_semantics<parallel>], iteration_bounds = array<i64: 1>, scalar_prefetch = 0 : i64, scratch_operands = 0 : i64, tpu.core_type = #tpu.core_type<tc>, window_params = [{transform_indices = @transform_0, window_bounds = array<i64: 8, 32>}, {pipeline_mode = #tpu.pipeline_mode<synchronous>, transform_indices = @transform_1, window_bounds = array<i64: 32, 32>}, {pipeline_mode = #tpu.pipeline_mode<synchronous>, transform_indices = @transform_2, window_bounds = array<i64: 1, 32>}, {transform_indices = @transform_3, window_bounds = array<i64: 8, 32>}]} {
    %c0 = arith.constant 0 : index
    %c0_0 = arith.constant 0 : index
    %0 = vector.load %arg1[%c0, %c0_0] : memref<8x32xf32, #tpu.memory_space<vmem>>, vector<8x32xf32>
    %c0_1 = arith.constant 0 : index
    %c0_2 = arith.constant 0 : index
    %1 = vector.load %arg2[%c0_1, %c0_2] : memref<32x32xf32, #tpu.memory_space<vmem>>, vector<32x32xf32>
    %cst = arith.constant dense<0.000000e+00> : vector<8x32xf32>
    %2 = tpu.matmul %0, %1, %cst {dimension_numbers = #tpu.dot_dimension_numbers<[1], [0], [0], [1], [0, 0, 1, 1], [], []>} : vector<8x32xf32>, vector<32x32xf32>, vector<8x32xf32> -> vector<8x32xf32>
    %c0_3 = arith.constant 0 : index
    %c0_4 = arith.constant 0 : index
    %3 = vector.load %arg3[%c0_3, %c0_4] : memref<1x32xf32, #tpu.memory_space<vmem>>, vector<1x32xf32>
    %4 = vector.broadcast %3 : vector<1x32xf32> to vector<8x32xf32>
    %5 = arith.addf %2, %4 : vector<8x32xf32>
    %c0_5 = arith.constant 0 : index
    %c0_6 = arith.constant 0 : index
    %6 = vector.load %arg4[%c0_5, %c0_6] : memref<8x32xf32, #tpu.memory_space<vmem>>, vector<8x32xf32>
    tpu.vector_store %arg4[%c0_5, %c0_6], %5 {strides = array<i32>} : memref<8x32xf32, #tpu.memory_space<vmem>>, vector<8x32xf32>,
    return
  }
  func.func @transform_0(%arg0: i32) -> (i32, i32) {
    %c0_i32 = arith.constant 0 : i32
    %c0_i32_0 = arith.constant 0 : i32
    return %arg0, %c0_i32 : i32, i32
  }
  func.func @transform_1(%arg0: i32) -> (i32, i32) {
    %c0_i32 = arith.constant 0 : i32
    %c0_i32_0 = arith.constant 0 : i32
    %c0_i32_1 = arith.constant 0 : i32
    return %c0_i32, %c0_i32_0 : i32, i32
  }
  func.func @transform_2(%arg0: i32) -> (i32, i32) {
    %c0_i32 = arith.constant 0 : i32
    %c0_i32_0 = arith.constant 0 : i32
    %c0_i32_1 = arith.constant 0 : i32
    return %c0_i32, %c0_i32_0 : i32, i32
  }
  func.func @transform_3(%arg0: i32) -> (i32, i32) {
    %c0_i32 = arith.constant 0 : i32
    %c0_i32_0 = arith.constant 0 : i32
    return %arg0, %c0_i32 : i32, i32
  }
}

</mosaic_0001>

<bundles_post_ra>
// kernel: tpu_custom_call.1
= control target key start
LH: loop header
LB: loop body
LE: loop exit
PB: predicated region body
PF: predicated region fallthrough
CT: control target
= control target key end

     0   :  { %8 = vsyncpa [#allocation3], 0  ;;  %s322_s0 = inlined_call_operand.hbm [shape: f32[8,32], index: 0, kind: input, shape index: {}]   ;;  %s323_s1 = inlined_call_operand.hbm [shape: f32[32,32], index: 1, kind: input, shape index: {}]   ;;  %s324_s2 = inlined_call_operand.vmem [shape: f32[1,32], index: 2, kind: input, shape index: {}]   ;;  %s325_s3 = inlined_call_operand.hbm [shape: f32[8,32], index: 3, kind: output, shape index: {}]  }
   0x1   :  { %9 = vsyncpa [#allocation6], 0 }
   0x2   :  { %10 = vsyncpa [#allocation4], 0  ;;  %s248_s12 = smov [#allocation2]   ;;  %s249_s14 = smov [#allocation5]  }
   0x3   :  { %s17_s13 = sshll.u32 %s248_s12, 4  ;;  %s26_s15 = sshll.u32 %s249_s14, 4  ;;  %s18_s13 = int_to_ptr.vmem [resolvable:$true] %s17_s13  ;;  %s276_s15 = int_to_ptr.vmem [resolvable:$true] %s26_s15 }
   0x4   :  { %s176_s18 = scalar_lea.hbm %s322_s0, 128 }
   0x5   :  { %p177_p0 = scmp.ne.s32.totalorder %s322_s0, %s176_s18  ;;  %p180_p1 = scmp.lt.u32.totalorder %s176_s18, %s322_s0 }
   0x7   :  { %p182_p2 = pnand %p180_p1, %p177_p0 }
   0x9   :  { %185 = shalt.err (!%p182_p2)
}
   0xa   :  { %s186_s23 = scalar_lea.vmem %s18_s13, 128  ;;  %p191_p4 = scmp.lt.s32.totalorder %s18_s13, %s18_s13 }
   0xb   :  { %p187_p3 = scmp.ne.s32.totalorder %s18_s13, %s186_s23  ;;  %p192_p5 = scmp.lt.s32.totalorder %s186_s23, %s186_s23 }
   0xd   :  { %p193_p6 = por %p192_p5, %p191_p4 }
   0xf   :  { %p194_p7 = pnand %p193_p6, %p187_p3 }
  0x11   :  { %197 = shalt.err (!%p194_p7)
}
  0x12   :  { %20 = dma.hbm_to_vmem [thread:$0]  %s322_s0, 128, %s18_s13, [#allocation3]  }
  0x13   :  { %s198_s28 = scalar_lea.hbm %s323_s1, 512 }
  0x14   :  { %p199_p8 = scmp.ne.s32.totalorder %s323_s1, %s198_s28  ;;  %p202_p9 = scmp.lt.u32.totalorder %s198_s28, %s323_s1 }
  0x16   :  { %p204_p10 = pnand %p202_p9, %p199_p8 }
  0x18   :  { %207 = shalt.err (!%p204_p10)
}
  0x19   :  { %s208_s6 = scalar_lea.vmem %s276_s15, 512  ;;  %p213_p12 = scmp.lt.s32.totalorder %s276_s15, %s276_s15 }
  0x1a   :  { %p209_p11 = scmp.ne.s32.totalorder %s276_s15, %s208_s6  ;;  %p214_p13 = scmp.lt.s32.totalorder %s208_s6, %s208_s6 }
  0x1c   :  { %p215_p0 = por %p214_p13, %p213_p12 }
  0x1e   :  { %p216_p1 = pnand %p215_p0, %p209_p11 }
  0x20   :  { %219 = shalt.err (!%p216_p1)
}
  0x21   :  { %s250_s0 = smov 128   ;;  %s251_s7 = smov 8  }
  0x22   :  { %32 = dma.hbm_to_vmem [thread:$0]  %s323_s1, 512, %s276_s15, [#allocation6], %s250_s0, %s250_s0, %s251_s7  }
  0x23   :  { %242 = dma.done.wait [#allocation3], 128  }
  0x24   :  { %243 = vsyncadd [#allocation3], 4294967168 }
  0x25   :  { %244 = dma.done.wait [#allocation6], 512  }
  0x26   :  { %245 = vsyncadd [#allocation6], 4294966784  ;;  %v252_v0 = vmov 0.0|0.0   ;;  %vm253_vm0 = vmmov 0   ;;  %v254_v1 = vmov 0.0   ;;  %v42_v2 = vld [vmem:[#allocation5] sm:$0xff] }
  0x27   :  { %162 = vmatprep.subr.bf16.mxu0 %v252_v0  ;;  %159 = vmatprep.mubr.msk.f32.mxu0 %vm253_vm0, %v254_v1  ;;  %v43_v3 = vld [vmem:[#allocation5 + $0x8] sm:$0xff]  ;;  %v44_v4 = vld [vmem:[#allocation5 + $0x10] sm:$0xff]  ;;  %v45_v6 = vld [vmem:[#allocation5 + $0x18] sm:$0xff]  ;;  %vm53_vm1 = vcmask 261120   ;;  %s255_s11 = smov [#allocation7]  }
  0x28   :  { %v163_v5 = vpack.c.bf16 %v43_v3, %v42_v2  ;;  %v166_v7 = vpack.c.bf16 %v45_v6, %v44_v4  ;;  %v41_v8 = vld [vmem:[#allocation2] sm:$0xff]  ;;  %s134_s12 = sshll.u32 %s255_s11, 4  ;;  %s135_s12 = int_to_ptr.vmem [resolvable:$true] %s134_s12 }
  0x29   :  { %v144_v9 = vld [vmem:[%s324_s2] ss:$0 sm:$0xff]  ;;  %s220_s13 = scalar_lea.vmem %s135_s12, 128  ;;  %p225_p3 = scmp.lt.s32.totalorder %s135_s12, %s135_s12 }
  0x2a   :  { %164 = vmatpush3.bf16.msra.mxu0 %v163_v5  ;;  %p221_p2 = scmp.ne.s32.totalorder %s135_s12, %s220_s13  ;;  %p226_p4 = scmp.lt.s32.totalorder %s220_s13, %s220_s13 }
  0x2b   :  { %165 = vmatprep.subr.bf16.mxu0 %v252_v0 }
  0x2c   :  { %p227_p5 = por %p226_p4, %p225_p3 }
  0x2e   :  { %167 = vmatpush3.bf16.msra.mxu0 %v166_v7  ;;  %p228_p6 = pnand %p227_p5, %p221_p2 }
  0x31   :  { %160 = vmatmul.mubr.msk.f32.vlgmr.msra.gmra.mrb[0].mxu0 %vm53_vm1, %v41_v8 }
 0x104   :  { %v123_v10 = vpop.f32.mrb[0].mxu0 }
 0x105   :  { %v124_v11 = vadd.f32 %v144_v9, %v123_v10  ;;  %v161_v12 = vpop.f32.mrb[1].mxu0 }
 0x107   :  { %127 = vst.msk [vmem:[#allocation7] sm:$0xff] %vm53_vm1, %v124_v11 }
 0x108   :  { %231 = shalt.err (!%p228_p6)
}
 0x109   :  { %s232_s16 = scalar_lea.hbm %s325_s3, 128 }
 0x10a   :  { %p233_p7 = scmp.ne.s32.totalorder %s325_s3, %s232_s16  ;;  %p236_p8 = scmp.lt.u32.totalorder %s232_s16, %s325_s3 }
 0x10c   :  { %p238_p9 = pnand %p236_p8, %p233_p7 }
 0x10e   :  { %241 = shalt.err (!%p238_p9)
}
 0x10f   :  { %137 = dma.vmem_to_hbm [thread:$0]  %s135_s12, 128, %s325_s3, [#allocation4]  }
 0x110   :  { %246 = dma.done.wait [#allocation4], 128  }
 0x111   :  { %247 = vsyncadd [#allocation4], 4294967168 }
 0x112   :  { %141 = vsyncpa [#allocation3], 1 }
 0x113   :  { %142 = vsyncpa [#allocation6], 1 }
 0x114   :  { %143 = vsyncpa [#allocation4], 1 }

// kernel: tpu_custom_call.1
= control target key start
LH: loop header
LB: loop body
LE: loop exit
PB: predicated region body
PF: predicated region fallthrough
CT: control target
= control target key end

     0   :  { %8 = vsyncpa [#allocation3], 0  ;;  %s322_s0 = inlined_call_operand.hbm [shape: f32[8,32], index: 0, kind: input, shape index: {}]   ;;  %s323_s1 = inlined_call_operand.hbm [shape: f32[32,32], index: 1, kind: input, shape index: {}]   ;;  %s324_s2 = inlined_call_operand.vmem [shape: f32[1,32], index: 2, kind: input, shape index: {}]   ;;  %s325_s3 = inlined_call_operand.hbm [shape: f32[8,32], index: 3, kind: output, shape index: {}]  }
   0x1   :  { %9 = vsyncpa [#allocation6], 0 }
   0x2   :  { %10 = vsyncpa [#allocation4], 0  ;;  %s248_s12 = smov [#allocation2]   ;;  %s249_s14 = smov [#allocation5]  }
   0x3   :  { %s17_s13 = sshll.u32 %s248_s12, 4  ;;  %s26_s15 = sshll.u32 %s249_s14, 4  ;;  %s18_s13 = int_to_ptr.vmem [resolvable:$true] %s17_s13  ;;  %s276_s15 = int_to_ptr.vmem [resolvable:$true] %s26_s15 }
   0x4   :  { %s176_s18 = scalar_lea.hbm %s322_s0, 128 }
   0x5   :  { %p177_p0 = scmp.ne.s32.totalorder %s322_s0, %s176_s18  ;;  %p180_p1 = scmp.lt.u32.totalorder %s176_s18, %s322_s0 }
   0x7   :  { %p182_p2 = pnand %p180_p1, %p177_p0 }
   0x9   :  { %185 = shalt.err (!%p182_p2)
}
   0xa   :  { %s186_s23 = scalar_lea.vmem %s18_s13, 128  ;;  %p191_p4 = scmp.lt.s32.totalorder %s18_s13, %s18_s13 }
   0xb   :  { %p187_p3 = scmp.ne.s32.totalorder %s18_s13, %s186_s23  ;;  %p192_p5 = scmp.lt.s32.totalorder %s186_s23, %s186_s23 }
   0xd   :  { %p193_p6 = por %p192_p5, %p191_p4 }
   0xf   :  { %p194_p7 = pnand %p193_p6, %p187_p3 }
  0x11   :  { %197 = shalt.err (!%p194_p7)
}
  0x12   :  { %20 = dma.hbm_to_vmem [thread:$0]  %s322_s0, 128, %s18_s13, [#allocation3]  }
  0x13   :  { %s198_s28 = scalar_lea.hbm %s323_s1, 512 }
  0x14   :  { %p199_p8 = scmp.ne.s32.totalorder %s323_s1, %s198_s28  ;;  %p202_p9 = scmp.lt.u32.totalorder %s198_s28, %s323_s1 }
  0x16   :  { %p204_p10 = pnand %p202_p9, %p199_p8 }
  0x18   :  { %207 = shalt.err (!%p204_p10)
}
  0x19   :  { %s208_s6 = scalar_lea.vmem %s276_s15, 512  ;;  %p213_p12 = scmp.lt.s32.totalorder %s276_s15, %s276_s15 }
  0x1a   :  { %p209_p11 = scmp.ne.s32.totalorder %s276_s15, %s208_s6  ;;  %p214_p13 = scmp.lt.s32.totalorder %s208_s6, %s208_s6 }
  0x1c   :  { %p215_p0 = por %p214_p13, %p213_p12 }
  0x1e   :  { %p216_p1 = pnand %p215_p0, %p209_p11 }
  0x20   :  { %219 = shalt.err (!%p216_p1)
}
  0x21   :  { %s250_s0 = smov 128   ;;  %s251_s7 = smov 8  }
  0x22   :  { %32 = dma.hbm_to_vmem [thread:$0]  %s323_s1, 512, %s276_s15, [#allocation6], %s250_s0, %s250_s0, %s251_s7  }
  0x23   :  { %242 = dma.done.wait [#allocation3], 128  }
  0x24   :  { %243 = vsyncadd [#allocation3], 4294967168 }
  0x25   :  { %244 = dma.done.wait [#allocation6], 512  }
  0x26   :  { %245 = vsyncadd [#allocation6], 4294966784  ;;  %v252_v0 = vmov 0.0|0.0   ;;  %vm253_vm0 = vmmov 0   ;;  %v254_v1 = vmov 0.0   ;;  %v42_v2 = vld [vmem:[#allocation5] sm:$0xff] }
  0x27   :  { %162 = vmatprep.subr.bf16.mxu0 %v252_v0  ;;  %159 = vmatprep.mubr.msk.f32.mxu0 %vm253_vm0, %v254_v1  ;;  %v43_v3 = vld [vmem:[#allocation5 + $0x8] sm:$0xff]  ;;  %v44_v4 = vld [vmem:[#allocation5 + $0x10] sm:$0xff]  ;;  %v45_v6 = vld [vmem:[#allocation5 + $0x18] sm:$0xff]  ;;  %vm53_vm1 = vcmask 261120   ;;  %s255_s11 = smov [#allocation7]  }
  0x28   :  { %v163_v5 = vpack.c.bf16 %v43_v3, %v42_v2  ;;  %v166_v7 = vpack.c.bf16 %v45_v6, %v44_v4  ;;  %v41_v8 = vld [vmem:[#allocation2] sm:$0xff]  ;;  %s134_s12 = sshll.u32 %s255_s11, 4  ;;  %s135_s12 = int_to_ptr.vmem [resolvable:$true] %s134_s12 }
  0x29   :  { %v144_v9 = vld [vmem:[%s324_s2] ss:$0 sm:$0xff]  ;;  %s220_s13 = scalar_lea.vmem %s135_s12, 128  ;;  %p225_p3 = scmp.lt.s32.totalorder %s135_s12, %s135_s12 }
  0x2a   :  { %164 = vmatpush3.bf16.msra.mxu0 %v163_v5  ;;  %p221_p2 = scmp.ne.s32.totalorder %s135_s12, %s220_s13  ;;  %p226_p4 = scmp.lt.s32.totalorder %s220_s13, %s220_s13 }
  0x2b   :  { %165 = vmatprep.subr.bf16.mxu0 %v252_v0 }
  0x2c   :  { %p227_p5 = por %p226_p4, %p225_p3 }
  0x2e   :  { %167 = vmatpush3.bf16.msra.mxu0 %v166_v7  ;;  %p228_p6 = pnand %p227_p5, %p221_p2 }
  0x31   :  { %160 = vmatmul.mubr.msk.f32.vlgmr.msra.gmra.mrb[0].mxu0 %vm53_vm1, %v41_v8 }
 0x104   :  { %v123_v10 = vpop.f32.mrb[0].mxu0 }
 0x105   :  { %v124_v11 = vadd.f32 %v144_v9, %v123_v10  ;;  %v161_v12 = vpop.f32.mrb[1].mxu0 }
 0x107   :  { %127 = vst.msk [vmem:[#allocation7] sm:$0xff] %vm53_vm1, %v124_v11 }
 0x108   :  { %231 = shalt.err (!%p228_p6)
}
 0x109   :  { %s232_s16 = scalar_lea.hbm %s325_s3, 128 }
 0x10a   :  { %p233_p7 = scmp.ne.s32.totalorder %s325_s3, %s232_s16  ;;  %p236_p8 = scmp.lt.u32.totalorder %s232_s16, %s325_s3 }
 0x10c   :  { %p238_p9 = pnand %p236_p8, %p233_p7 }
 0x10e   :  { %241 = shalt.err (!%p238_p9)
}
 0x10f   :  { %137 = dma.vmem_to_hbm [thread:$0]  %s135_s12, 128, %s325_s3, [#allocation4]  }
 0x110   :  { %246 = dma.done.wait [#allocation4], 128  }
 0x111   :  { %247 = vsyncadd [#allocation4], 4294967168 }
 0x112   :  { %141 = vsyncpa [#allocation3], 1 }
 0x113   :  { %142 = vsyncpa [#allocation6], 1 }
 0x114   :  { %143 = vsyncpa [#allocation4], 1 }

</bundles_post_ra>
